<compile_context>
chip_gen: v7x
topology: tpu7x:2x2x1
jax: 0.10.0
libtpu: 0.0.40
codegen_flags: <defaults>
</compile_context>

<pallas_src>
import functools

import jax
import jax.numpy as jnp
from jax.experimental import pallas as pl
from jax.experimental.pallas import tpu as pltpu


C_PAD = 128  # lane-dense padded class / hidden dimension

_VMEM = pl.BlockSpec(memory_space=pltpu.MemorySpace.VMEM)


# ----------------------------- kernels -------------------------------------


def _avg_consensus_kernel(feat_ref, w_ref, b_ref, out_ref, *,
                          batch, segments, num_causes, num_effects):
    """consensus_type == 'average'.

    feat_ref: (B*S, H)   w_ref: (H, C_PAD)=[wc|we|0]   b_ref: (1, C_PAD)
    out_ref : (B, C_PAD) ; padded lanes hold -inf and are sliced off outside.
    """
    rows = batch * segments

    # Single fused score matmul on the MXU (native dtypes, f32 accumulation).
    scores = jnp.dot(feat_ref[...], w_ref[...],
                     preferred_element_type=jnp.float32)
    scores = scores + b_ref[...].astype(jnp.float32)          # (B*S, C_PAD)

    # Per-head softmax: lane masks split cause head [0,Cc) / effect head [Cc,C).
    lane = jax.lax.broadcasted_iota(jnp.int32, (rows, C_PAD), 1)
    is_c = lane < num_causes
    is_e = (lane >= num_causes) & (lane < num_causes + num_effects)

    neg = jnp.float32(-1e30)
    m_c = jnp.max(jnp.where(is_c, scores, neg), axis=-1, keepdims=True)
    m_e = jnp.max(jnp.where(is_e, scores, neg), axis=-1, keepdims=True)
    m = jnp.where(is_c, m_c, m_e)                              # per-lane head max

    e = jnp.exp(scores - m)
    e = jnp.where(is_c | is_e, e, 0.0)                         # zero padded lanes

    sum_c = jnp.sum(jnp.where(is_c, e, 0.0), axis=-1, keepdims=True)
    sum_e = jnp.sum(jnp.where(is_e, e, 0.0), axis=-1, keepdims=True)

    # EUP approx reciprocal + one Newton step -> ~full f32 accuracy, near free.
    inv_c = pl.reciprocal(sum_c, approx=True)
    inv_c = inv_c * (2.0 - sum_c * inv_c)
    inv_e = pl.reciprocal(sum_e, approx=True)
    inv_e = inv_e * (2.0 - sum_e * inv_e)
    inv = jnp.where(is_c, inv_c, inv_e)

    # Fold 1/S into the per-row scale (exact: power of two), then segment mean
    # as a tile-aligned sublane reduce: (B*S,128) -> (B,S,128) -> sum(axis=1).
    probs = e * (inv * (1.0 / segments))                       # (B*S, C_PAD)
    mean = jnp.sum(probs.reshape(batch, segments, C_PAD), axis=1)  # (B, C_PAD)

    # Padded lanes are exactly 0 -> log gives -inf there; sliced off outside.
    out_ref[...] = jnp.log(mean).astype(out_ref.dtype)


def _linear_consensus_kernel(feat_ref, wl_ref, bl_ref, ws_ref, bs_ref, out_ref):
    """consensus_type == 'linear'.

    feat_ref: (B, S*H)    wl_ref: (S*H, 128)   bl_ref: (1, 128)
    ws_ref  : (128, 128)  bs_ref: (1, 128)     out_ref: (B, 128)
    All padding lanes/rows are zeros, so results are exact.
    """
    hidden = jnp.dot(feat_ref[...], wl_ref[...],
                     preferred_element_type=jnp.float32)
    hidden = hidden + bl_ref[...].astype(jnp.float32)          # (B, 128)
    out = jnp.dot(hidden, ws_ref[...], preferred_element_type=jnp.float32)
    out_ref[...] = (out + bs_ref[...].astype(jnp.float32)).astype(out_ref.dtype)


# ----------------------- one-time parameter fusion ---------------------------
# Done once at "module init"; NOT inside the per-call jitted path.


def fuse_average_params(wc, bc, we, be):
    C = wc.shape[1] + we.shape[1]
    pad = C_PAD - C
    w = jnp.pad(jnp.concatenate([wc, we], axis=1), ((0, 0), (0, pad)))
    b = jnp.pad(jnp.concatenate([bc, be], axis=1), ((0, 0), (0, pad)),
                constant_values=-1e30)
    return w, b


def fuse_linear_params(wl, bl, wc, bc, we, be):
    H = wl.shape[1]
    C = wc.shape[1] + we.shape[1]
    wl_p = jnp.pad(wl, ((0, 0), (0, C_PAD - H)))                    # (S*H, 128)
    bl_p = jnp.pad(bl, ((0, 0), (0, C_PAD - H)))                    # (1, 128)
    ws = jnp.concatenate([wc, we], axis=1)                          # (H, C)
    bs = jnp.concatenate([bc, be], axis=1)                          # (1, C)
    ws_p = jnp.pad(ws, ((0, C_PAD - H), (0, C_PAD - C)))            # (128, 128)
    bs_p = jnp.pad(bs, ((0, 0), (0, C_PAD - C)))                    # (1, 128)
    return wl_p, bl_p, ws_p, bs_p


# ----------------------------- jitted wrappers -------------------------------


@functools.partial(jax.jit,
                   static_argnames=("batch", "segments",
                                    "num_causes", "num_effects"))
def consensus_average(feat, w_fused, b_fused, *, batch, segments,
                      num_causes, num_effects):
    H = feat.shape[-1]
    feat2d = feat.reshape(batch * segments, H)
    out = pl.pallas_call(
        functools.partial(_avg_consensus_kernel, batch=batch,
                          segments=segments, num_causes=num_causes,
                          num_effects=num_effects),
        out_shape=jax.ShapeDtypeStruct((batch, C_PAD), jnp.float32),
        in_specs=[_VMEM, _VMEM, _VMEM],
        out_specs=_VMEM,
    )(feat2d, w_fused, b_fused)
    return [out[:, :num_causes],
            out[:, num_causes:num_causes + num_effects]]


@functools.partial(jax.jit,
                   static_argnames=("batch", "num_causes", "num_effects"))
def consensus_linear(feat, wl_p, bl_p, ws_p, bs_p, *, batch,
                     num_causes, num_effects):
    feat2d = feat.reshape(batch, -1)
    out = pl.pallas_call(
        _linear_consensus_kernel,
        out_shape=jax.ShapeDtypeStruct((batch, C_PAD), jnp.float32),
        in_specs=[_VMEM, _VMEM, _VMEM, _VMEM, _VMEM],
        out_specs=_VMEM,
    )(feat2d, wl_p, bl_p, ws_p, bs_p)
    return [out[:, :num_causes],
            out[:, num_causes:num_causes + num_effects]]


# ------------------------- pure-JAX references -------------------------------


def ref_average(feat, wc, bc, we, be):
    sc = jnp.einsum("bsh,hc->bsc", feat, wc) + bc.reshape(1, 1, -1)
    se = jnp.einsum("bsh,hc->bsc", feat, we) + be.reshape(1, 1, -1)
    pc = jax.nn.softmax(sc, axis=2)
    pe = jax.nn.softmax(se, axis=2)
    return [jnp.log(pc.mean(axis=1)), jnp.log(pe.mean(axis=1))]


def ref_linear(feat, wl, bl, wc, bc, we, be):
    B = feat.shape[0]
    f = feat.reshape(B, -1)
    ft = f @ wl + bl
    return [ft @ wc + bc, ft @ we + be]


# ------------------------------- main ----------------------------------------


if __name__ == "__main__":
    # Module hyperparameters (p / dataset analogues)
    B = 2              # batch
    S = 8              # num_segments (== sublane count -> tile-aligned reduce)
    H = 32             # hidden_size
    NUM_CAUSES = 16
    NUM_EFFECTS = 24

    key = jax.random.PRNGKey(0)
    k_feat, k_wc, k_bc, k_we, k_be, k_wl, k_bl = jax.random.split(key, 7)

    feat = jax.random.normal(k_feat, (B, S, H), dtype=jnp.float32)

    # Deterministic parameter init (Linear weights stored as (in, out)).
    wc = jax.random.normal(k_wc, (H, NUM_CAUSES), dtype=jnp.float32) * 0.1
    bc = jax.random.normal(k_bc, (1, NUM_CAUSES), dtype=jnp.float32) * 0.1
    we = jax.random.normal(k_we, (H, NUM_EFFECTS), dtype=jnp.float32) * 0.1
    be = jax.random.normal(k_be, (1, NUM_EFFECTS), dtype=jnp.float32) * 0.1
    wl = jax.random.normal(k_wl, (S * H, H), dtype=jnp.float32) * 0.05
    bl = jax.random.normal(k_bl, (1, H), dtype=jnp.float32) * 0.05

    # One-time "module init" weight fusion / padding (hoisted out of per-call path).
    w_avg, b_avg = jax.block_until_ready(fuse_average_params(wc, bc, we, be))
    wl_p, bl_p, ws_p, bs_p = jax.block_until_ready(
        fuse_linear_params(wl, bl, wc, bc, we, be))

    # --- consensus_type == 'average' ---
    lc_a, le_a = consensus_average(feat, w_avg, b_avg, batch=B, segments=S,
                                   num_causes=NUM_CAUSES,
                                   num_effects=NUM_EFFECTS)
    jax.block_until_ready((lc_a, le_a))
    rc_a, re_a = ref_average(feat, wc, bc, we, be)
    assert jnp.allclose(lc_a, rc_a, atol=1e-5, rtol=1e-5)
    assert jnp.allclose(le_a, re_a, atol=1e-5, rtol=1e-5)

    # --- consensus_type == 'linear' ---
    lc_l, le_l = consensus_linear(feat, wl_p, bl_p, ws_p, bs_p, batch=B,
                                  num_causes=NUM_CAUSES,
                                  num_effects=NUM_EFFECTS)
    jax.block_until_ready((lc_l, le_l))
    rc_l, re_l = ref_linear(feat, wl, bl, wc, bc, we, be)
    assert jnp.allclose(lc_l, rc_l, atol=1e-4, rtol=1e-4)
    assert jnp.allclose(le_l, re_l, atol=1e-4, rtol=1e-4)

    print("KERNEL_OK")
</pallas_src>

<mosaic_0001>
module attributes {stable_mosaic.version = 11 : i64} {
  func.func @_avg_consensus_kernel(%arg0: memref<16x32xf32, #tpu.memory_space<vmem>>, %arg1: memref<32x128xf32, #tpu.memory_space<vmem>>, %arg2: memref<1x128xf32, #tpu.memory_space<vmem>>, %arg3: memref<2x128xf32, #tpu.memory_space<vmem>>) attributes {dimension_semantics = [], scalar_prefetch = 0 : i64, scratch_operands = 0 : i64, tpu.core_type = #tpu.core_type<tc>} {
    %c0 = arith.constant 0 : index
    %c0_0 = arith.constant 0 : index
    %0 = vector.load %arg0[%c0, %c0_0] : memref<16x32xf32, #tpu.memory_space<vmem>>, vector<16x32xf32>
    %c0_1 = arith.constant 0 : index
    %c0_2 = arith.constant 0 : index
    %1 = vector.load %arg1[%c0_1, %c0_2] : memref<32x128xf32, #tpu.memory_space<vmem>>, vector<32x128xf32>
    %cst = arith.constant dense<0.000000e+00> : vector<16x128xf32>
    %2 = tpu.matmul %0, %1, %cst {dimension_numbers = #tpu.dot_dimension_numbers<[1], [0], [0], [1], [0, 0, 1, 1], [], []>} : vector<16x32xf32>, vector<32x128xf32>, vector<16x128xf32> -> vector<16x128xf32>
    %c0_3 = arith.constant 0 : index
    %c0_4 = arith.constant 0 : index
    %3 = vector.load %arg2[%c0_3, %c0_4] : memref<1x128xf32, #tpu.memory_space<vmem>>, vector<1x128xf32>
    %4 = vector.broadcast %3 : vector<1x128xf32> to vector<16x128xf32>
    %5 = arith.addf %2, %4 : vector<16x128xf32>
    %6 = tpu.iota {dimensions = array<i32: 1>} : vector<16x128xi32>
    %c16_i32 = arith.constant 16 : i32
    %7 = vector.broadcast %c16_i32 : i32 to vector<16x128xi32>
    %8 = arith.cmpi slt, %6, %7 : vector<16x128xi32>
    %c16_i32_5 = arith.constant 16 : i32
    %9 = vector.broadcast %c16_i32_5 : i32 to vector<16x128xi32>
    %10 = arith.cmpi sge, %6, %9 : vector<16x128xi32>
    %c40_i32 = arith.constant 40 : i32
    %11 = vector.broadcast %c40_i32 : i32 to vector<16x128xi32>
    %12 = arith.cmpi slt, %6, %11 : vector<16x128xi32>
    %13 = arith.andi %10, %12 : vector<16x128xi1>
    %cst_6 = arith.constant -1.000000e+30 : f32
    %14 = vector.broadcast %cst_6 : f32 to vector<16x128xf32>
    %15 = arith.select %8, %5, %14 : vector<16x128xi1>, vector<16x128xf32>
    %cst_7 = arith.constant dense<0xFF800000> : vector<16xf32>
    %16 = vector.multi_reduction <maximumf>, %15, %cst_7 [1] : vector<16x128xf32> to vector<16xf32>
    %17 = vector.shape_cast %16 : vector<16xf32> to vector<16x1xf32>
    %cst_8 = arith.constant -1.000000e+30 : f32
    %18 = vector.broadcast %cst_8 : f32 to vector<16x128xf32>
    %19 = arith.select %13, %5, %18 : vector<16x128xi1>, vector<16x128xf32>
    %cst_9 = arith.constant dense<0xFF800000> : vector<16xf32>
    %20 = vector.multi_reduction <maximumf>, %19, %cst_9 [1] : vector<16x128xf32> to vector<16xf32>
    %21 = vector.shape_cast %20 : vector<16xf32> to vector<16x1xf32>
    %22 = vector.shape_cast %17 : vector<16x1xf32> to vector<16x1xf32>
    %23 = vector.broadcast %22 : vector<16x1xf32> to vector<16x128xf32>
    %24 = vector.shape_cast %21 : vector<16x1xf32> to vector<16x1xf32>
    %25 = vector.broadcast %24 : vector<16x1xf32> to vector<16x128xf32>
    %26 = arith.select %8, %23, %25 : vector<16x128xi1>, vector<16x128xf32>
    %27 = arith.subf %5, %26 : vector<16x128xf32>
    %28 = math.exp %27 : vector<16x128xf32>
    %29 = arith.ori %8, %13 : vector<16x128xi1>
    %cst_10 = arith.constant 0.000000e+00 : f32
    %30 = vector.broadcast %cst_10 : f32 to vector<16x128xf32>
    %31 = arith.select %29, %28, %30 : vector<16x128xi1>, vector<16x128xf32>
    %cst_11 = arith.constant 0.000000e+00 : f32
    %32 = vector.broadcast %cst_11 : f32 to vector<16x128xf32>
    %33 = arith.select %8, %31, %32 : vector<16x128xi1>, vector<16x128xf32>
    %cst_12 = arith.constant dense<0.000000e+00> : vector<16xf32>
    %34 = vector.multi_reduction <add>, %33, %cst_12 [1] : vector<16x128xf32> to vector<16xf32>
    %35 = vector.shape_cast %34 : vector<16xf32> to vector<16x1xf32>
    %cst_13 = arith.constant 0.000000e+00 : f32
    %36 = vector.broadcast %cst_13 : f32 to vector<16x128xf32>
    %37 = arith.select %13, %31, %36 : vector<16x128xi1>, vector<16x128xf32>
    %cst_14 = arith.constant dense<0.000000e+00> : vector<16xf32>
    %38 = vector.multi_reduction <add>, %37, %cst_14 [1] : vector<16x128xf32> to vector<16xf32>
    %39 = vector.shape_cast %38 : vector<16xf32> to vector<16x1xf32>
    %40 = tpu.reciprocal %35 {approx = true} : vector<16x1xf32> -> vector<16x1xf32>
    %41 = arith.mulf %35, %40 : vector<16x1xf32>
    %cst_15 = arith.constant 2.000000e+00 : f32
    %42 = vector.broadcast %cst_15 : f32 to vector<16x1xf32>
    %43 = arith.subf %42, %41 : vector<16x1xf32>
    %44 = arith.mulf %40, %43 : vector<16x1xf32>
    %45 = tpu.reciprocal %39 {approx = true} : vector<16x1xf32> -> vector<16x1xf32>
    %46 = arith.mulf %39, %45 : vector<16x1xf32>
    %cst_16 = arith.constant 2.000000e+00 : f32
    %47 = vector.broadcast %cst_16 : f32 to vector<16x1xf32>
    %48 = arith.subf %47, %46 : vector<16x1xf32>
    %49 = arith.mulf %45, %48 : vector<16x1xf32>
    %50 = vector.shape_cast %44 : vector<16x1xf32> to vector<16x1xf32>
    %51 = vector.broadcast %50 : vector<16x1xf32> to vector<16x128xf32>
    %52 = vector.shape_cast %49 : vector<16x1xf32> to vector<16x1xf32>
    %53 = vector.broadcast %52 : vector<16x1xf32> to vector<16x128xf32>
    %54 = arith.select %8, %51, %53 : vector<16x128xi1>, vector<16x128xf32>
    %cst_17 = arith.constant 1.250000e-01 : f32
    %55 = vector.broadcast %cst_17 : f32 to vector<16x128xf32>
    %56 = arith.mulf %54, %55 : vector<16x128xf32>
    %57 = arith.mulf %31, %56 : vector<16x128xf32>
    %58 = vector.shape_cast %57 : vector<16x128xf32> to vector<2x8x128xf32>
    %cst_18 = arith.constant dense<0.000000e+00> : vector<2x128xf32>
    %59 = vector.multi_reduction <add>, %58, %cst_18 [1] : vector<2x8x128xf32> to vector<2x128xf32>
    %60 = math.log %59 : vector<2x128xf32>
    %c0_19 = arith.constant 0 : index
    %c0_20 = arith.constant 0 : index
    %61 = vector.load %arg3[%c0_19, %c0_20] : memref<2x128xf32, #tpu.memory_space<vmem>>, vector<2x128xf32>
    tpu.vector_store %arg3[%c0_19, %c0_20], %60 {strides = array<i32>} : memref<2x128xf32, #tpu.memory_space<vmem>>, vector<2x128xf32>,
    return
  }
}

</mosaic_0001>

<bundles_post_ra>
// kernel: consensus_average.1
= control target key start
LH: loop header
LB: loop body
LE: loop exit
PB: predicated region body
PF: predicated region fallthrough
CT: control target
= control target key end

     0   :  { %8 = vsyncpa [#allocation3], 0  ;;  %s415_s0 = inlined_call_operand.hbm [shape: f32[16,32], index: 0, kind: input, shape index: {}]   ;;  %s416_s1 = inlined_call_operand.hbm [shape: f32[32,128], index: 1, kind: input, shape index: {}]   ;;  %s417_s2 = inlined_call_operand.vmem [shape: f32[1,128], index: 2, kind: input, shape index: {}]   ;;  %s418_s3 = inlined_call_operand.vmem [shape: f32[2,128], index: 3, kind: output, shape index: {}]  }
   0x1   :  { %9 = vsyncpa [#allocation5], 0  ;;  %s324_s12 = smov [#allocation2]   ;;  %s276_s16 = scalar_lea.hbm %s415_s0, 256 }
   0x2   :  { %s15_s13 = sshll.u32 %s324_s12, 4  ;;  %p277_p0 = scmp.ne.s32.totalorder %s415_s0, %s276_s16  ;;  %s16_s13 = int_to_ptr.vmem [resolvable:$true] %s15_s13 }
   0x3   :  { %p280_p1 = scmp.lt.u32.totalorder %s276_s16, %s415_s0 }
   0x5   :  { %p282_p2 = pnand %p280_p1, %p277_p0 }
   0x7   :  { %285 = shalt.err (!%p282_p2)
}
   0x8   :  { %s286_s21 = scalar_lea.vmem %s16_s13, 256  ;;  %p291_p4 = scmp.lt.s32.totalorder %s16_s13, %s16_s13 }
   0x9   :  { %p287_p3 = scmp.ne.s32.totalorder %s16_s13, %s286_s21  ;;  %p292_p5 = scmp.lt.s32.totalorder %s286_s21, %s286_s21 }
   0xb   :  { %p293_p6 = por %p292_p5, %p291_p4 }
   0xd   :  { %p294_p7 = pnand %p293_p6, %p287_p3 }
   0xf   :  { %297 = shalt.err (!%p294_p7)
}
  0x10   :  { %s325_s22 = smov 128   ;;  %s326_s23 = smov 8  }
  0x11   :  { %21 = dma.hbm_to_vmem [thread:$0]  %s415_s0, 256, %s16_s13, [#allocation3], %s325_s22, %s325_s22, %s326_s23  }
  0x12   :  { %s327_s26 = smov [#allocation4]   ;;  %s298_s30 = scalar_lea.hbm %s416_s1, 512 }
  0x13   :  { %s27_s27 = sshll.u32 %s327_s26, 4  ;;  %p299_p8 = scmp.ne.s32.totalorder %s416_s1, %s298_s30  ;;  %s28_s27 = int_to_ptr.vmem [resolvable:$true] %s27_s27 }
  0x14   :  { %p302_p9 = scmp.lt.u32.totalorder %s298_s30, %s416_s1 }
  0x16   :  { %p304_p10 = pnand %p302_p9, %p299_p8 }
  0x18   :  { %307 = shalt.err (!%p304_p10)
}
  0x19   :  { %s308_s8 = scalar_lea.vmem %s28_s27, 512  ;;  %p313_p12 = scmp.lt.s32.totalorder %s28_s27, %s28_s27 }
  0x1a   :  { %p309_p11 = scmp.ne.s32.totalorder %s28_s27, %s308_s8  ;;  %p314_p13 = scmp.lt.s32.totalorder %s308_s8, %s308_s8 }
  0x1c   :  { %p315_p0 = por %p314_p13, %p313_p12 }
  0x1e   :  { %p316_p1 = pnand %p315_p0, %p309_p11 }
  0x20   :  { %319 = shalt.err (!%p316_p1)
}
  0x21   :  { %33 = dma.hbm_to_vmem [thread:$0]  %s416_s1, 512, %s28_s27, [#allocation5], %s325_s22, %s325_s22, %s326_s23  }
  0x22   :  { %320 = dma.done.wait [#allocation3], 256  }
  0x23   :  { %321 = vsyncadd [#allocation3], 4294967040 }
  0x24   :  { %322 = dma.done.wait [#allocation5], 512  }
  0x25   :  { %323 = vsyncadd [#allocation5], 4294966784  ;;  %vm55_vm0 = vcmask 261120   ;;  %v44_v0 = vld [vmem:[#allocation4] sm:$0xff]  ;;  %v45_v1 = vld [vmem:[#allocation4 + $0x8] sm:$0xff]  ;;  %v137_v8 = vlaneseq  ;;  %vm218_vm6 = vcmask 1041409  }
  0x26   :  { %v46_v2 = vld [vmem:[#allocation4 + $0x10] sm:$0xff]  ;;  %v248_v3 = vpack.c.bf16 %v45_v1, %v44_v0  ;;  %v47_v4 = vld [vmem:[#allocation4 + $0x18] sm:$0xff] }
  0x27   :  { %v42_v5 = vld [vmem:[#allocation2] sm:$0xff]  ;;  %v252_v6 = vpack.c.bf16 %v47_v4, %v46_v2  ;;  %v43_v7 = vld [vmem:[#allocation2 + $0x8] sm:$0xff]  ;;  %v372_v9 = vand.u32 127, %v137_v8 }
  0x28   :  { %245 = vmatprep.mubr.msk.f32.mxu0 %vm55_vm0, %v42_v5  ;;  %249 = vmatprep.subr.bf16.mxu0 %v248_v3  ;;  %v228_v10 = vld [vmem:[%s417_s2] ss:$0 sm:$0xff] }
  0x29   :  { %251 = vmatpush3.bf16.msra.mxu0 %v248_v3  ;;  %vm140_vm1 = vcmp.ge.s32.totalorder %v372_v9, 16  ;;  %vm141_vm2 = vcmp.lt.s32.totalorder %v372_v9, 40  ;;  %vm139_vm3 = vcmp.lt.s32.totalorder %v372_v9, 16 }
  0x2a   :  { %253 = vmatprep.subr.bf16.mxu0 %v252_v6  ;;  %vm380_vm4 = vmand %vm140_vm1, %vm141_vm2 }
  0x2b   :  { %vm163_vm5 = vmor %vm139_vm3, %vm380_vm4 }
  0x2d   :  { %255 = vmatpush3.bf16.msra.mxu0 %v252_v6 }
  0x30   :  { %246 = vmatmul.mubr.msk.f32.vlgmr.msra.gmra.mrb[0].mxu0 %vm55_vm0, %v43_v7 }
 0x103   :  { %v247_v11 = vpop.f32.mrb[0].mxu0 }
 0x104   :  { %v128_v12 = vpop.f32.mrb[1].mxu0  ;;  %v134_v15 = vadd.f32 %v247_v11, %v228_v10 }
 0x105   :  { %v129_v14 = vadd.f32 %v228_v10, %v128_v12 }
 0x106   :  { %v150_v18 = vsel %vm380_vm4, %v134_v15, -1e+30  ;;  %v144_v19 = vsel %vm139_vm3, %v134_v15, -1e+30 }
 0x107   :  { %v149_v16 = vsel %vm380_vm4, %v129_v14, -1e+30  ;;  %v143_v17 = vsel %vm139_vm3, %v129_v14, -1e+30 }
 0x108   :  { %151 = vmax.xlane.f32.xlu1 %v149_v16  ;;  %145 = vmax.xlane.f32.xlu0 %v143_v17 }
 0x10c   :  { %153 = vmax.xlane.f32.xlu1 %v150_v18  ;;  %147 = vmax.xlane.f32.xlu0 %v144_v19 }
 0x195   :  { %v152_v20 = vpop.xlane.xlu1 %151  ;;  %v146_v21 = vpop.xlane.xlu0 %145 }
 0x196   :  { %v155_v22 = vsel %vm139_vm3, %v146_v21, %v152_v20 }
 0x197   :  { %v157_v23 = vsub.f32 %v129_v14, %v155_v22 }
 0x199   :  { %v159_v24 = vmul.f32 1.442695, %v157_v23  ;;  %v154_v25 = vpop.xlane.xlu1 %153  ;;  %v148_v26 = vpop.xlane.xlu0 %147 }
 0x19a   :  { %v156_v27 = vsel %vm139_vm3, %v148_v26, %v154_v25 }
 0x19b   :  { %260 = vpow2.f32 %v159_v24  ;;  %v158_v28 = vsub.f32 %v134_v15, %v156_v27 }
 0x19d   :  { %v161_v29 = vmul.f32 1.442695, %v158_v28 }
 0x19f   :  { %262 = vpow2.f32 %v161_v29 }
 0x1a5   :  { %v261_v30 = vpop.eup %260 }
 0x1a6   :  { %v164_v31 = vsel %vm163_vm5, %v261_v30, 0.0 }
 0x1a7   :  { %v166_v32 = vsel %vm139_vm3, %v164_v31, 0.0  ;;  %v172_v35 = vsel %vm380_vm4, %v164_v31, 0.0 }
 0x1a8   :  { %168 = vadd.xlane.f32.xlu0 %v166_v32 }
 0x1a9   :  { %v263_v33 = vpop.eup %262 }
 0x1aa   :  { %v165_v34 = vsel %vm163_vm5, %v263_v33, 0.0 }
 0x1ab   :  { %v167_v36 = vsel %vm139_vm3, %v165_v34, 0.0  ;;  %v173_v37 = vsel %vm380_vm4, %v165_v34, 0.0 }
 0x1ac   :  { %174 = vadd.xlane.f32.xlu0 %v172_v35  ;;  %170 = vadd.xlane.f32.xlu1 %v167_v36 }
 0x1b0   :  { %176 = vadd.xlane.f32.xlu1 %v173_v37 }
 0x235   :  { %v169_v38 = vpop.xlane.xlu0 %168 }
 0x236   :  { %264 = vrcp.f32 %v169_v38 }
 0x239   :  { %v171_v39 = vpop.xlane.xlu1 %170  ;;  %v175_v40 = vpop.xlane.xlu0 %174 }
 0x23a   :  { %266 = vrcp.f32 %v171_v39 }
 0x23b   :  { %268 = vrcp.f32 %v175_v40 }
 0x23d   :  { %v177_v41 = vpop.xlane.xlu1 %176 }
 0x23e   :  { %270 = vrcp.f32 %v177_v41 }
 0x240   :  { %v265_v42 = vpop.eup %264 }
 0x241   :  { %v180_v43 = vmul.f32 %v265_v42, %v169_v38 }
 0x243   :  { %v182_v47 = vsub.f32 2.0, %v180_v43 }
 0x244   :  { %v267_v44 = vpop.eup %266 }
 0x245   :  { %v269_v45 = vpop.eup %268  ;;  %v181_v46 = vmul.f32 %v267_v44, %v171_v39  ;;  %v184_v53 = vmul.f32 %v265_v42, %v182_v47 }
 0x246   :  { %v188_v48 = vmul.f32 %v269_v45, %v175_v40 }
 0x247   :  { %v183_v51 = vsub.f32 2.0, %v181_v46 }
 0x248   :  { %v271_v49 = vpop.eup %270  ;;  %v190_v50 = vsub.f32 2.0, %v188_v48 }
 0x249   :  { %v189_v52 = vmul.f32 %v271_v49, %v177_v41  ;;  %v185_v57 = vmul.f32 %v267_v44, %v183_v51 }
 0x24a   :  { %v192_v54 = vmul.f32 %v269_v45, %v190_v50 }
 0x24b   :  { %v191_v55 = vsub.f32 2.0, %v189_v52 }
 0x24c   :  { %v194_v56 = vsel %vm139_vm3, %v184_v53, %v192_v54 }
 0x24d   :  { %v196_v58 = vmul.f32 0.125, %v194_v56  ;;  %v193_v59 = vmul.f32 %v271_v49, %v191_v55 }
 0x24f   :  { %v198_v60 = vmul.f32 %v196_v58, %v164_v31  ;;  %v195_v61 = vsel %vm139_vm3, %v185_v57, %v193_v59 }
 0x250   :  { %v197_v62 = vmul.f32 0.125, %v195_v61 }
 0x251   :  { %v200_v63 = vrot.slane %v198_v60, 4 }
 0x252   :  { %v199_v0 = vmul.f32 %v197_v62, %v165_v34 }
 0x253   :  { %v201_v1 = vadd.f32 %v200_v63, %v198_v60 }
 0x254   :  { %v206_v2 = vrot.slane %v199_v0, 4 }
 0x255   :  { %v202_v3 = vrot.slane %v201_v1, 2 }
 0x256   :  { %v207_v4 = vadd.f32 %v206_v2, %v199_v0 }
 0x257   :  { %v203_v5 = vadd.f32 %v202_v3, %v201_v1 }
 0x258   :  { %v208_v6 = vrot.slane %v207_v4, 2 }
 0x259   :  { %v204_v7 = vrot.slane %v203_v5, 1 }
 0x25a   :  { %v209_v8 = vadd.f32 %v208_v6, %v207_v4 }
 0x25b   :  { %v205_v10 = vadd.f32 %v204_v7, %v203_v5 }
 0x25c   :  { %v210_v11 = vrot.slane %v209_v8, 1 }
 0x25d   :  { %272 = vlog2.f32 %v205_v10 }
 0x25e   :  { %v211_v12 = vadd.f32 %v210_v11, %v209_v8 }
 0x260   :  { %274 = vlog2.f32 %v211_v12 }
 0x267   :  { %v273_v13 = vpop.eup %272 }
 0x268   :  { %v213_v9 = vmul.f32 0.6931472, %v273_v13 }
 0x26a   :  { %v275_v14 = vpop.eup %274 }
 0x26b   :  { %v215_v15 = vmul.f32 0.6931472, %v275_v14 }
 0x26d   :  { %v219_v16 = vsel %vm218_vm6, %v215_v15, %v213_v9 }
 0x26e   :  { %221 = vst [vmem:[%s418_s3] sm:$0x3] %v219_v16 }
 0x26f   :  { %226 = vsyncpa [#allocation3], 1 }
 0x270   :  { %227 = vsyncpa [#allocation5], 1 }

</bundles_post_ra>
